<compile_context>
chip_gen: v6e
topology: v6e:2x2x1
jax: 0.10.0
libtpu: 0.0.40
codegen_flags: <defaults>
</compile_context>

<pallas_src>
import math
import functools

import jax
import jax.numpy as jnp
from jax import lax
from jax.experimental import pallas as pl
from jax.experimental.pallas import tpu as pltpu


def _mha_kernel(x_ref, wq_ref, bq_ref, wk_ref, bk_ref, wv_ref, bv_ref,
                wo_ref, bo_ref, o_ref, k_scr, v_scr, *, num_heads, tq):
    """One (batch, query-tile) grid step.

    x_ref  : (1, L, E)  VMEM bf16  full sequence (re-DMAed only when b changes)
    wq_ref : (H, E, D)  VMEM bf16  per-head Wq^T, 1/sqrt(D) folded in
    bq_ref : (H, 1, D)  VMEM f32   per-head q bias (scaled)
    wk_ref : (H, E, D)  VMEM bf16
    bk_ref : (H, 1, D)  VMEM f32
    wv_ref : (H, E, D)  VMEM bf16
    bv_ref : (H, 1, D)  VMEM f32
    wo_ref : (H, D, E)  VMEM bf16  per-head rows of Wo^T
    bo_ref : (1, E)     VMEM f32
    o_ref  : (1, TQ, E) VMEM f32   output tile, doubles as the f32 accumulator
    k_scr  : (H, L, D)  VMEM bf16  persists across the q tiles of one batch
    v_scr  : (H, L, D)  VMEM bf16
    """
    E = x_ref.shape[2]

    # ---- K / V projection: once per batch (first q tile only) into VMEM scratch ----
    @pl.when(pl.program_id(1) == 0)
    def _():
        def kv_body(h, carry):
            x_full = x_ref[0]                                            # (L, E) bf16
            k_h = jnp.dot(x_full, wk_ref[h],
                          preferred_element_type=jnp.float32) + bk_ref[h]
            v_h = jnp.dot(x_full, wv_ref[h],
                          preferred_element_type=jnp.float32) + bv_ref[h]
            k_scr[h] = k_h.astype(k_scr.dtype)                           # (L, D)
            v_scr[h] = v_h.astype(v_scr.dtype)
            return carry
        lax.fori_loop(0, num_heads, kv_body, 0)

    # ---- output accumulator lives in the VMEM output block, seeded with bo ----
    o_ref[0] = jnp.broadcast_to(bo_ref[...], (tq, E)).astype(o_ref.dtype)

    row0 = pl.multiple_of(pl.program_id(1) * tq, tq)

    # ---- attention: one head at a time (fori_loop bounds live ranges) ----
    def head_body(h, carry):
        x_tile = x_ref[0, pl.ds(row0, tq), :]                            # (TQ, E) bf16
        # Q projection for this tile only (K/V already in scratch). Scale folded in.
        qh = jnp.dot(x_tile, wq_ref[h],
                     preferred_element_type=jnp.float32) + bq_ref[h]     # (TQ, D) f32
        kh = k_scr[h]                                                    # (L, D) bf16
        vh = v_scr[h]                                                    # (L, D) bf16

        # scores = qh @ kh^T without an in-kernel transpose (contract D dims).
        s = lax.dot_general(qh.astype(jnp.bfloat16), kh,
                            (((1,), (1,)), ((), ())),
                            preferred_element_type=jnp.float32)          # (TQ, L)
        s = s - jnp.max(s, axis=-1, keepdims=True)
        p = jnp.exp(s)
        p = p * pl.reciprocal(jnp.sum(p, axis=-1, keepdims=True), approx=True)

        ctx_h = jnp.dot(p.astype(jnp.bfloat16), vh,
                        preferred_element_type=jnp.float32)              # (TQ, D)

        # Per-head output projection, accumulated straight into the output block.
        o_ref[0] += jnp.dot(ctx_h.astype(jnp.bfloat16), wo_ref[h],
                            preferred_element_type=jnp.float32).astype(o_ref.dtype)
        return carry

    lax.fori_loop(0, num_heads, head_body, 0)


def efficient_mha(x, params, *, num_heads):
    """x: (B, L, E) float32.  params: dict of weights (see init_params)."""
    B, L, E = x.shape
    H = num_heads
    assert E % H == 0
    D = E // H
    scale = 1.0 / math.sqrt(D)

    # Query-tile size: whole sequence for small L, 128-row tiles otherwise.
    tq = L if L <= 128 else 128
    assert L % tq == 0, "L must be a multiple of the query tile size"
    n_q = L // tq

    # --- host-side weight preprocessing (keeps transposes/XLU out of the kernel) ---
    # Per-head in-proj: head h uses rows h*D:(h+1)*D of W; store W[hD:(h+1)D,:]^T.
    def per_head_in(w):                                   # (E, E) -> (H, E, D)
        return jnp.transpose(w.reshape(H, D, E), (0, 2, 1))

    wq_h = (per_head_in(params["wq"]) * scale).astype(jnp.bfloat16)
    wk_h = per_head_in(params["wk"]).astype(jnp.bfloat16)
    wv_h = per_head_in(params["wv"]).astype(jnp.bfloat16)
    bq_h = (params["bq"] * scale).reshape(H, 1, D).astype(jnp.float32)
    bk_h = params["bk"].reshape(H, 1, D).astype(jnp.float32)
    bv_h = params["bv"].reshape(H, 1, D).astype(jnp.float32)
    # Output projection: y = ctx @ Wo^T = sum_h ctx_h @ (Wo^T)[hD:(h+1)D, :]
    wo_h = params["wo"].T.reshape(H, D, E).astype(jnp.bfloat16)          # (H, D, E)
    bo = params["bo"].reshape(1, E).astype(jnp.float32)

    x_bf16 = x.astype(jnp.bfloat16)   # halve HBM->VMEM DMA for the dominant operand

    # --- VMEM budget from the actual resident set, capped by device capacity ---
    resident = (2 * L * E * 2          # x block (bf16, double-buffered)
                + 2 * L * E * 2        # K/V scratch (bf16)
                + 4 * E * E * 2        # weights (bf16, single-buffered)
                + 2 * tq * E * 4       # output block (f32, double-buffered)
                + 3 * tq * L * 4       # per-head score/prob f32 values
                + 4 * tq * E * 4)      # misc per-step values / slack
    try:
        vmem_cap = pltpu.get_tpu_info().vmem_capacity_bytes
    except Exception:
        vmem_cap = 64 * 1024 * 1024
    vmem_limit = int(min(max(resident + (8 << 20), 32 << 20), (vmem_cap * 3) // 4))

    # --- cost estimate reflecting what the kernel actually executes ---
    flops = B * (8 * L * E * E         # Q + K + V + out projections (each once)
                 + 4 * L * L * E)      # QK^T + PV over all heads
    bytes_accessed = int(x_bf16.size * 2 + B * L * E * 4
                         + (wq_h.size + wk_h.size + wv_h.size + wo_h.size) * 2
                         + (bq_h.size + bk_h.size + bv_h.size + bo.size) * 4)
    cost = pl.CostEstimate(flops=int(flops),
                           transcendentals=int(B * H * L * L),
                           bytes_accessed=bytes_accessed)

    # Constant operands: single-buffer (their block never changes across the grid).
    const_spec = functools.partial(pl.BlockSpec,
                                   pipeline_mode=pl.Buffered(buffer_count=1))

    kernel = functools.partial(_mha_kernel, num_heads=H, tq=tq)

    return pl.pallas_call(
        kernel,
        out_shape=jax.ShapeDtypeStruct((B, L, E), jnp.float32),
        grid_spec=pltpu.PrefetchScalarGridSpec(
            num_scalar_prefetch=0,
            grid=(B, n_q),
            in_specs=[
                pl.BlockSpec((1, L, E), lambda b, q: (b, 0, 0)),     # x (full seq)
                const_spec((H, E, D), lambda b, q: (0, 0, 0)),       # Wq^T (scaled)
                const_spec((H, 1, D), lambda b, q: (0, 0, 0)),       # bq (scaled)
                const_spec((H, E, D), lambda b, q: (0, 0, 0)),       # Wk^T
                const_spec((H, 1, D), lambda b, q: (0, 0, 0)),       # bk
                const_spec((H, E, D), lambda b, q: (0, 0, 0)),       # Wv^T
                const_spec((H, 1, D), lambda b, q: (0, 0, 0)),       # bv
                const_spec((H, D, E), lambda b, q: (0, 0, 0)),       # Wo^T per head
                const_spec((1, E), lambda b, q: (0, 0)),             # bo
            ],
            out_specs=pl.BlockSpec((1, tq, E), lambda b, q: (b, q, 0)),
            scratch_shapes=[
                pltpu.VMEM((H, L, D), jnp.bfloat16),                 # K scratch
                pltpu.VMEM((H, L, D), jnp.bfloat16),                 # V scratch
            ],
        ),
        compiler_params=pltpu.CompilerParams(
            # q axis must stay sequential (K/V scratch computed at q==0);
            # batch axis is sharded across tensorcores.
            dimension_semantics=("parallel", "arbitrary"),
            vmem_limit_bytes=vmem_limit,
        ),
        cost_estimate=cost,
    )(x_bf16, wq_h, bq_h, wk_h, bk_h, wv_h, bv_h, wo_h, bo)


def init_params(key, dim):
    """Parameters mimicking nn.MultiheadAttention shapes (PyTorch convention:
    y = x @ W^T + b).  Small non-zero biases to exercise the bias path."""
    kq, kk, kv, ko, kb = jax.random.split(key, 5)
    bound = math.sqrt(6.0 / (dim + dim))  # xavier_uniform-like
    uni = lambda k: jax.random.uniform(k, (dim, dim), jnp.float32, -bound, bound)
    b1, b2, b3, b4 = jax.random.split(kb, 4)
    small = lambda k: 0.05 * jax.random.normal(k, (1, dim), jnp.float32)
    return {
        "wq": uni(kq), "wk": uni(kk), "wv": uni(kv),
        "bq": small(b1), "bk": small(b2), "bv": small(b3),
        "wo": uni(ko), "bo": small(b4),
    }


def _reference_mha(x, params, *, num_heads):
    """Pure-JAX f32 reference (semantics of torch.nn.MultiheadAttention fwd)."""
    B, L, E = x.shape
    D = E // num_heads
    q = x @ params["wq"].T + params["bq"]
    k = x @ params["wk"].T + params["bk"]
    v = x @ params["wv"].T + params["bv"]
    q = q.reshape(B, L, num_heads, D).transpose(0, 2, 1, 3)
    k = k.reshape(B, L, num_heads, D).transpose(0, 2, 1, 3)
    v = v.reshape(B, L, num_heads, D).transpose(0, 2, 1, 3)
    s = jnp.einsum("bhld,bhmd->bhlm", q, k) / math.sqrt(D)
    p = jax.nn.softmax(s, axis=-1)
    ctx = jnp.einsum("bhlm,bhmd->bhld", p, v)
    ctx = ctx.transpose(0, 2, 1, 3).reshape(B, L, E)
    return ctx @ params["wo"].T + params["bo"]


if __name__ == "__main__":
    B, L, E, H = 2, 8, 32, 8   # num_heads=8 default -> dim divisible by 8

    key = jax.random.PRNGKey(0)
    kx, kp = jax.random.split(key)
    x = jax.random.normal(kx, (B, L, E), jnp.float32)
    params = init_params(kp, E)

    out = jax.block_until_ready(efficient_mha(x, params, num_heads=H))

    ref = _reference_mha(x, params, num_heads=H)
    assert out.shape == (B, L, E)
    # bf16 matmul inputs (f32 accumulation) -> looser tolerance than pure f32.
    err = float(jnp.max(jnp.abs(out - ref)))
    assert jnp.allclose(out, ref, atol=5e-2, rtol=5e-2), f"mismatch, max abs err={err}"

    print("KERNEL_OK")
</pallas_src>

<mosaic_0001>
module attributes {stable_mosaic.version = 11 : i64} {
  func.func @_mha_kernel(%arg0: i32, %arg1: i32, %arg2: memref<1x8x32xbf16, #tpu.memory_space<vmem>>, %arg3: memref<8x32x4xbf16, #tpu.memory_space<vmem>>, %arg4: memref<8x1x4xf32, #tpu.memory_space<vmem>>, %arg5: memref<8x32x4xbf16, #tpu.memory_space<vmem>>, %arg6: memref<8x1x4xf32, #tpu.memory_space<vmem>>, %arg7: memref<8x32x4xbf16, #tpu.memory_space<vmem>>, %arg8: memref<8x1x4xf32, #tpu.memory_space<vmem>>, %arg9: memref<8x4x32xbf16, #tpu.memory_space<vmem>>, %arg10: memref<1x32xf32, #tpu.memory_space<vmem>>, %arg11: memref<1x8x32xf32, #tpu.memory_space<vmem>>, %arg12: memref<8x8x4xbf16, #tpu.memory_space<vmem>>, %arg13: memref<8x8x4xbf16, #tpu.memory_space<vmem>>) attributes {dimension_semantics = [#tpu.dimension_semantics<parallel>, #tpu.dimension_semantics<arbitrary>], iteration_bounds = array<i64: 2, 1>, scalar_prefetch = 0 : i64, scratch_operands = 2 : i64, tpu.core_type = #tpu.core_type<tc>, window_params = [{transform_indices = @transform_0, window_bounds = array<i64: 1, 8, 32>}, {pipeline_mode = #tpu.pipeline_mode<synchronous>, transform_indices = @transform_1, window_bounds = array<i64: 8, 32, 4>}, {pipeline_mode = #tpu.pipeline_mode<synchronous>, transform_indices = @transform_2, window_bounds = array<i64: 8, 1, 4>}, {pipeline_mode = #tpu.pipeline_mode<synchronous>, transform_indices = @transform_3, window_bounds = array<i64: 8, 32, 4>}, {pipeline_mode = #tpu.pipeline_mode<synchronous>, transform_indices = @transform_4, window_bounds = array<i64: 8, 1, 4>}, {pipeline_mode = #tpu.pipeline_mode<synchronous>, transform_indices = @transform_5, window_bounds = array<i64: 8, 32, 4>}, {pipeline_mode = #tpu.pipeline_mode<synchronous>, transform_indices = @transform_6, window_bounds = array<i64: 8, 1, 4>}, {pipeline_mode = #tpu.pipeline_mode<synchronous>, transform_indices = @transform_7, window_bounds = array<i64: 8, 4, 32>}, {pipeline_mode = #tpu.pipeline_mode<synchronous>, transform_indices = @transform_8, window_bounds = array<i64: 1, 32>}, {transform_indices = @transform_9, window_bounds = array<i64: 1, 8, 32>}]} {
    %c0_i32 = arith.constant 0 : i32
    %0 = arith.cmpi eq, %arg1, %c0_i32 : i32
    %1 = arith.extui %0 : i1 to i32
    %c0_i32_0 = arith.constant 0 : i32
    %2 = arith.cmpi ne, %1, %c0_i32_0 : i32
    scf.if %2 {
      %c0_i32_8 = arith.constant 0 : i32
      %c8_i32_9 = arith.constant 8 : i32
      %12 = arith.addi %c0_i32_8, %c8_i32_9 : i32
      %c1_i32_10 = arith.constant 1 : i32
      scf.for %arg14 = %c0_i32_8 to %12 step %c1_i32_10  : i32 {
        %c0_12 = arith.constant 0 : index
        %c0_13 = arith.constant 0 : index
        %c0_14 = arith.constant 0 : index
        %13 = vector.load %arg2[%c0_12, %c0_13, %c0_14] : memref<1x8x32xbf16, #tpu.memory_space<vmem>>, vector<1x8x32xbf16>
        %14 = vector.shape_cast %13 : vector<1x8x32xbf16> to vector<8x32xbf16>
        %15 = arith.index_cast %arg14 : i32 to index
        %c0_15 = arith.constant 0 : index
        %c0_16 = arith.constant 0 : index
        %16 = vector.load %arg5[%15, %c0_15, %c0_16] : memref<8x32x4xbf16, #tpu.memory_space<vmem>>, vector<1x32x4xbf16>
        %17 = vector.shape_cast %16 : vector<1x32x4xbf16> to vector<32x4xbf16>
        %cst = arith.constant dense<0.000000e+00> : vector<8x4xf32>
        %18 = tpu.matmul %14, %17, %cst {dimension_numbers = #tpu.dot_dimension_numbers<[1], [0], [0], [1], [0, 0, 1, 1], [], []>} : vector<8x32xbf16>, vector<32x4xbf16>, vector<8x4xf32> -> vector<8x4xf32>
        %19 = arith.index_cast %arg14 : i32 to index
        %c0_17 = arith.constant 0 : index
        %c0_18 = arith.constant 0 : index
        %20 = vector.load %arg6[%19, %c0_17, %c0_18] : memref<8x1x4xf32, #tpu.memory_space<vmem>>, vector<1x1x4xf32>
        %21 = vector.shape_cast %20 : vector<1x1x4xf32> to vector<1x4xf32>
        %22 = vector.broadcast %21 : vector<1x4xf32> to vector<8x4xf32>
        %23 = arith.addf %18, %22 : vector<8x4xf32>
        %24 = arith.index_cast %arg14 : i32 to index
        %c0_19 = arith.constant 0 : index
        %c0_20 = arith.constant 0 : index
        %25 = vector.load %arg7[%24, %c0_19, %c0_20] : memref<8x32x4xbf16, #tpu.memory_space<vmem>>, vector<1x32x4xbf16>
        %26 = vector.shape_cast %25 : vector<1x32x4xbf16> to vector<32x4xbf16>
        %cst_21 = arith.constant dense<0.000000e+00> : vector<8x4xf32>
        %27 = tpu.matmul %14, %26, %cst_21 {dimension_numbers = #tpu.dot_dimension_numbers<[1], [0], [0], [1], [0, 0, 1, 1], [], []>} : vector<8x32xbf16>, vector<32x4xbf16>, vector<8x4xf32> -> vector<8x4xf32>
        %28 = arith.index_cast %arg14 : i32 to index
        %c0_22 = arith.constant 0 : index
        %c0_23 = arith.constant 0 : index
        %29 = vector.load %arg8[%28, %c0_22, %c0_23] : memref<8x1x4xf32, #tpu.memory_space<vmem>>, vector<1x1x4xf32>
        %30 = vector.shape_cast %29 : vector<1x1x4xf32> to vector<1x4xf32>
        %31 = vector.broadcast %30 : vector<1x4xf32> to vector<8x4xf32>
        %32 = arith.addf %27, %31 : vector<8x4xf32>
        %33 = arith.truncf %23 : vector<8x4xf32> to vector<8x4xbf16>
        %34 = arith.index_cast %arg14 : i32 to index
        %c0_24 = arith.constant 0 : index
        %c0_25 = arith.constant 0 : index
        %35 = vector.load %arg12[%34, %c0_24, %c0_25] : memref<8x8x4xbf16, #tpu.memory_space<vmem>>, vector<1x8x4xbf16>
        %36 = vector.shape_cast %35 : vector<1x8x4xbf16> to vector<8x4xbf16>
        %37 = vector.shape_cast %33 : vector<8x4xbf16> to vector<1x8x4xbf16>
        tpu.vector_store %arg12[%34, %c0_24, %c0_25], %37 {strides = array<i32>} : memref<8x8x4xbf16, #tpu.memory_space<vmem>>, vector<1x8x4xbf16>,
        %38 = arith.truncf %32 : vector<8x4xf32> to vector<8x4xbf16>
        %39 = arith.index_cast %arg14 : i32 to index
        %c0_26 = arith.constant 0 : index
        %c0_27 = arith.constant 0 : index
        %40 = vector.load %arg13[%39, %c0_26, %c0_27] : memref<8x8x4xbf16, #tpu.memory_space<vmem>>, vector<1x8x4xbf16>
        %41 = vector.shape_cast %40 : vector<1x8x4xbf16> to vector<8x4xbf16>
        %42 = vector.shape_cast %38 : vector<8x4xbf16> to vector<1x8x4xbf16>
        tpu.vector_store %arg13[%39, %c0_26, %c0_27], %42 {strides = array<i32>} : memref<8x8x4xbf16, #tpu.memory_space<vmem>>, vector<1x8x4xbf16>,
      }
      %c8_i32_11 = arith.constant 8 : i32
    } else {
    }
    %c0 = arith.constant 0 : index
    %c0_1 = arith.constant 0 : index
    %3 = vector.load %arg10[%c0, %c0_1] : memref<1x32xf32, #tpu.memory_space<vmem>>, vector<1x32xf32>
    %4 = vector.shape_cast %3 : vector<1x32xf32> to vector<1x32xf32>
    %5 = vector.broadcast %4 : vector<1x32xf32> to vector<8x32xf32>
    %c0_2 = arith.constant 0 : index
    %c0_3 = arith.constant 0 : index
    %c0_4 = arith.constant 0 : index
    %6 = vector.load %arg11[%c0_2, %c0_3, %c0_4] : memref<1x8x32xf32, #tpu.memory_space<vmem>>, vector<1x8x32xf32>
    %7 = vector.shape_cast %6 : vector<1x8x32xf32> to vector<8x32xf32>
    %8 = vector.shape_cast %5 : vector<8x32xf32> to vector<1x8x32xf32>
    tpu.vector_store %arg11[%c0_2, %c0_3, %c0_4], %8 {strides = array<i32>} : memref<1x8x32xf32, #tpu.memory_space<vmem>>, vector<1x8x32xf32>,
    %c8_i32 = arith.constant 8 : i32
    %9 = arith.muli %arg1, %c8_i32 : i32
    %10 = tpu.assume_multiple %9, 8 : i32
    %c0_i32_5 = arith.constant 0 : i32
    %c8_i32_6 = arith.constant 8 : i32
    %11 = arith.addi %c0_i32_5, %c8_i32_6 : i32
    %c1_i32 = arith.constant 1 : i32
    scf.for %arg14 = %c0_i32_5 to %11 step %c1_i32  : i32 {
      %c0_8 = arith.constant 0 : index
      %12 = arith.index_cast %10 : i32 to index
      %c0_9 = arith.constant 0 : index
      %13 = vector.load %arg2[%c0_8, %12, %c0_9] : memref<1x8x32xbf16, #tpu.memory_space<vmem>>, vector<1x8x32xbf16>
      %14 = vector.shape_cast %13 : vector<1x8x32xbf16> to vector<8x32xbf16>
      %15 = arith.index_cast %arg14 : i32 to index
      %c0_10 = arith.constant 0 : index
      %c0_11 = arith.constant 0 : index
      %16 = vector.load %arg3[%15, %c0_10, %c0_11] : memref<8x32x4xbf16, #tpu.memory_space<vmem>>, vector<1x32x4xbf16>
      %17 = vector.shape_cast %16 : vector<1x32x4xbf16> to vector<32x4xbf16>
      %cst = arith.constant dense<0.000000e+00> : vector<8x4xf32>
      %18 = tpu.matmul %14, %17, %cst {dimension_numbers = #tpu.dot_dimension_numbers<[1], [0], [0], [1], [0, 0, 1, 1], [], []>} : vector<8x32xbf16>, vector<32x4xbf16>, vector<8x4xf32> -> vector<8x4xf32>
      %19 = arith.index_cast %arg14 : i32 to index
      %c0_12 = arith.constant 0 : index
      %c0_13 = arith.constant 0 : index
      %20 = vector.load %arg4[%19, %c0_12, %c0_13] : memref<8x1x4xf32, #tpu.memory_space<vmem>>, vector<1x1x4xf32>
      %21 = vector.shape_cast %20 : vector<1x1x4xf32> to vector<1x4xf32>
      %22 = vector.broadcast %21 : vector<1x4xf32> to vector<8x4xf32>
      %23 = arith.addf %18, %22 : vector<8x4xf32>
      %24 = arith.index_cast %arg14 : i32 to index
      %c0_14 = arith.constant 0 : index
      %c0_15 = arith.constant 0 : index
      %25 = vector.load %arg12[%24, %c0_14, %c0_15] : memref<8x8x4xbf16, #tpu.memory_space<vmem>>, vector<1x8x4xbf16>
      %26 = vector.shape_cast %25 : vector<1x8x4xbf16> to vector<8x4xbf16>
      %27 = arith.index_cast %arg14 : i32 to index
      %c0_16 = arith.constant 0 : index
      %c0_17 = arith.constant 0 : index
      %28 = vector.load %arg13[%27, %c0_16, %c0_17] : memref<8x8x4xbf16, #tpu.memory_space<vmem>>, vector<1x8x4xbf16>
      %29 = vector.shape_cast %28 : vector<1x8x4xbf16> to vector<8x4xbf16>
      %30 = arith.truncf %23 : vector<8x4xf32> to vector<8x4xbf16>
      %cst_18 = arith.constant dense<0.000000e+00> : vector<8x8xf32>
      %31 = tpu.matmul %30, %26, %cst_18 {dimension_numbers = #tpu.dot_dimension_numbers<[1], [1], [0], [0], [0, 0, 1, 0], [], []>} : vector<8x4xbf16>, vector<8x4xbf16>, vector<8x8xf32> -> vector<8x8xf32>
      %cst_19 = arith.constant dense<0xFF800000> : vector<8xf32>
      %32 = vector.multi_reduction <maximumf>, %31, %cst_19 [1] : vector<8x8xf32> to vector<8xf32>
      %33 = vector.shape_cast %32 : vector<8xf32> to vector<8x1xf32>
      %34 = vector.broadcast %33 : vector<8x1xf32> to vector<8x8xf32>
      %35 = arith.subf %31, %34 : vector<8x8xf32>
      %36 = math.exp %35 : vector<8x8xf32>
      %cst_20 = arith.constant dense<0.000000e+00> : vector<8xf32>
      %37 = vector.multi_reduction <add>, %36, %cst_20 [1] : vector<8x8xf32> to vector<8xf32>
      %38 = vector.shape_cast %37 : vector<8xf32> to vector<8x1xf32>
      %39 = tpu.reciprocal %38 {approx = true} : vector<8x1xf32> -> vector<8x1xf32>
      %40 = vector.broadcast %39 : vector<8x1xf32> to vector<8x8xf32>
      %41 = arith.mulf %36, %40 : vector<8x8xf32>
      %42 = arith.truncf %41 : vector<8x8xf32> to vector<8x8xbf16>
      %cst_21 = arith.constant dense<0.000000e+00> : vector<8x4xf32>
      %43 = tpu.matmul %42, %29, %cst_21 {dimension_numbers = #tpu.dot_dimension_numbers<[1], [0], [0], [1], [0, 0, 1, 1], [], []>} : vector<8x8xbf16>, vector<8x4xbf16>, vector<8x4xf32> -> vector<8x4xf32>
      %c0_22 = arith.constant 0 : index
      %c0_23 = arith.constant 0 : index
      %c0_24 = arith.constant 0 : index
      %44 = vector.load %arg11[%c0_22, %c0_23, %c0_24] : memref<1x8x32xf32, #tpu.memory_space<vmem>>, vector<1x8x32xf32>
      %45 = vector.shape_cast %44 : vector<1x8x32xf32> to vector<8x32xf32>
      %46 = arith.truncf %43 : vector<8x4xf32> to vector<8x4xbf16>
      %47 = arith.index_cast %arg14 : i32 to index
      %c0_25 = arith.constant 0 : index
      %c0_26 = arith.constant 0 : index
      %48 = vector.load %arg9[%47, %c0_25, %c0_26] : memref<8x4x32xbf16, #tpu.memory_space<vmem>>, vector<1x4x32xbf16>
      %49 = vector.shape_cast %48 : vector<1x4x32xbf16> to vector<4x32xbf16>
      %cst_27 = arith.constant dense<0.000000e+00> : vector<8x32xf32>
      %50 = tpu.matmul %46, %49, %cst_27 {dimension_numbers = #tpu.dot_dimension_numbers<[1], [0], [0], [1], [0, 0, 1, 1], [], []>} : vector<8x4xbf16>, vector<4x32xbf16>, vector<8x32xf32> -> vector<8x32xf32>
      %51 = arith.addf %45, %50 : vector<8x32xf32>
      %c0_28 = arith.constant 0 : index
      %c0_29 = arith.constant 0 : index
      %c0_30 = arith.constant 0 : index
      %52 = vector.load %arg11[%c0_28, %c0_29, %c0_30] : memref<1x8x32xf32, #tpu.memory_space<vmem>>, vector<1x8x32xf32>
      %53 = vector.shape_cast %52 : vector<1x8x32xf32> to vector<8x32xf32>
      %54 = vector.shape_cast %51 : vector<8x32xf32> to vector<1x8x32xf32>
      tpu.vector_store %arg11[%c0_28, %c0_29, %c0_30], %54 {strides = array<i32>} : memref<1x8x32xf32, #tpu.memory_space<vmem>>, vector<1x8x32xf32>,
    }
    %c8_i32_7 = arith.constant 8 : i32
    return
  }
  func.func @transform_0(%arg0: i32, %arg1: i32) -> (i32, i32, i32) {
    %c0_i32 = arith.constant 0 : i32
    %c0_i32_0 = arith.constant 0 : i32
    %c0_i32_1 = arith.constant 0 : i32
    return %arg0, %c0_i32, %c0_i32_0 : i32, i32, i32
  }
  func.func @transform_1(%arg0: i32, %arg1: i32) -> (i32, i32, i32) {
    %c0_i32 = arith.constant 0 : i32
    %c0_i32_0 = arith.constant 0 : i32
    %c0_i32_1 = arith.constant 0 : i32
    %c0_i32_2 = arith.constant 0 : i32
    return %c0_i32, %c0_i32_0, %c0_i32_1 : i32, i32, i32
  }
  func.func @transform_2(%arg0: i32, %arg1: i32) -> (i32, i32, i32) {
    %c0_i32 = arith.constant 0 : i32
    %c0_i32_0 = arith.constant 0 : i32
    %c0_i32_1 = arith.constant 0 : i32
    %c0_i32_2 = arith.constant 0 : i32
    return %c0_i32, %c0_i32_0, %c0_i32_1 : i32, i32, i32
  }
  func.func @transform_3(%arg0: i32, %arg1: i32) -> (i32, i32, i32) {
    %c0_i32 = arith.constant 0 : i32
    %c0_i32_0 = arith.constant 0 : i32
    %c0_i32_1 = arith.constant 0 : i32
    %c0_i32_2 = arith.constant 0 : i32
    return %c0_i32, %c0_i32_0, %c0_i32_1 : i32, i32, i32
  }
  func.func @transform_4(%arg0: i32, %arg1: i32) -> (i32, i32, i32) {
    %c0_i32 = arith.constant 0 : i32
    %c0_i32_0 = arith.constant 0 : i32
    %c0_i32_1 = arith.constant 0 : i32
    %c0_i32_2 = arith.constant 0 : i32
    return %c0_i32, %c0_i32_0, %c0_i32_1 : i32, i32, i32
  }
  func.func @transform_5(%arg0: i32, %arg1: i32) -> (i32, i32, i32) {
    %c0_i32 = arith.constant 0 : i32
    %c0_i32_0 = arith.constant 0 : i32
    %c0_i32_1 = arith.constant 0 : i32
    %c0_i32_2 = arith.constant 0 : i32
    return %c0_i32, %c0_i32_0, %c0_i32_1 : i32, i32, i32
  }
  func.func @transform_6(%arg0: i32, %arg1: i32) -> (i32, i32, i32) {
    %c0_i32 = arith.constant 0 : i32
    %c0_i32_0 = arith.constant 0 : i32
    %c0_i32_1 = arith.constant 0 : i32
    %c0_i32_2 = arith.constant 0 : i32
    return %c0_i32, %c0_i32_0, %c0_i32_1 : i32, i32, i32
  }
  func.func @transform_7(%arg0: i32, %arg1: i32) -> (i32, i32, i32) {
    %c0_i32 = arith.constant 0 : i32
    %c0_i32_0 = arith.constant 0 : i32
    %c0_i32_1 = arith.constant 0 : i32
    %c0_i32_2 = arith.constant 0 : i32
    return %c0_i32, %c0_i32_0, %c0_i32_1 : i32, i32, i32
  }
  func.func @transform_8(%arg0: i32, %arg1: i32) -> (i32, i32) {
    %c0_i32 = arith.constant 0 : i32
    %c0_i32_0 = arith.constant 0 : i32
    %c0_i32_1 = arith.constant 0 : i32
    return %c0_i32, %c0_i32_0 : i32, i32
  }
  func.func @transform_9(%arg0: i32, %arg1: i32) -> (i32, i32, i32) {
    %c0_i32 = arith.constant 0 : i32
    %c0_i32_0 = arith.constant 0 : i32
    return %arg0, %arg1, %c0_i32 : i32, i32, i32
  }
}

</mosaic_0001>

<bundles_post_ra>
// kernel: tpu_custom_call.1
= control target key start
LH: loop header
LB: loop body
LE: loop exit
PB: predicated region body
PF: predicated region fallthrough
CT: control target
= control target key end

     0   :  { %s1384_s0 = inlined_call_operand.vmem [shape: bf16[2,8,32], index: 0, kind: input, shape index: {}]   ;;  %s1385_s1 = inlined_call_operand.vmem [shape: bf16[8,32,4], index: 1, kind: input, shape index: {}]   ;;  %s1386_s2 = inlined_call_operand.vmem [shape: f32[8,1,4], index: 2, kind: input, shape index: {}]   ;;  %s1387_s3 = inlined_call_operand.vmem [shape: bf16[8,32,4], index: 3, kind: input, shape index: {}]   ;;  %s1388_s4 = inlined_call_operand.vmem [shape: f32[8,1,4], index: 4, kind: input, shape index: {}]   ;;  %s1389_s5 = inlined_call_operand.vmem [shape: bf16[8,32,4], index: 5, kind: input, shape index: {}]   ;;  %s1390_s6 = inlined_call_operand.vmem [shape: f32[8,1,4], index: 6, kind: input, shape index: {}]   ;;  %s1391_s7 = inlined_call_operand.vmem [shape: bf16[8,4,32], index: 7, kind: input, shape index: {}]   ;;  %s1392_s8 = inlined_call_operand.vmem [shape: f32[1,32], index: 8, kind: input, shape index: {}]   ;;  %s1393_s9 = inlined_call_operand.hbm [shape: f32[2,8,32], index: 9, kind: output, shape index: {}]  }
   0x1   :  { %1395 = sst [smem:[#allocation7_spill]] %s1384_s0 }
   0x2   :  { %14 = vsyncpa [#allocation5], 0 }
   0x3   :  { %16 = vsyncpa [#allocation5 + $0x1], 0  ;;  %s1204_s30 = smov 0   ;;  %s1206_s10 = smov 0  }
   0x4   :  { %s1208_s11 = smov 0   ;;  %s1210_s12 = smov 0  }
   0x5   :  { %s1212_s13 = smov 0   ;;  %s1214_s14 = smov 0  }
   0x6 LB: > { %s873_s15 = sadd.s32 4294967295, %s1139_s14   ;;  %s874_s16 = sadd.s32 4294967294, %s1139_s14   ;;  %s1139_s14 = sphi %s1214_s14, %s22_s14   ;;  %s1135_s13 = sphi %s1212_s13, %s1404_s13   ;;  %s1131_s12 = sphi %s1210_s12, %s1403_s12   ;;  %s1127_s11 = sphi %s1208_s11, %s1402_s11   ;;  %s1123_s10 = sphi %s1206_s10, %s1401_s10   ;;  %s1119_s30 = sphi %s1204_s30, %s1400_s30  }
   0x7   : > { %s34_s17 = sadd.s32 1, %s1135_s13  ;;  %s237_s18 = sadd.s32 1, %s1127_s11 }
   0x8   : > { %p36_p0 = scmp.ge.s32.totalorder %s34_s17, 2  ;;  %p247_p1 = scmp.ne.s32.totalorder %s1127_s11, %s1123_s10 }
   0x9   : > { %p248_p2 = scmp.eq.s32.totalorder %s873_s15, 1  ;;  %p253_p3 = scmp.ne.s32.totalorder %s1123_s10, %s1119_s30 }
   0xa   : > { %s1406_s17 = smov (%p36_p0, %s34_s17), 0  ;;  %p254_p5 = scmp.eq.s32.totalorder %s874_s16, 1 }
   0xb   : > { %p1244_p4 = por %p248_p2, %p247_p1  ;;  %s232_s20 = ssub.s32 %s1135_s13, %s1406_s17 }
   0xc   : > { %p877_p6 = scmp.ge.s32.totalorder %s1139_s14, 1  ;;  %p235_p7 = scmp.eq.s32.totalorder %s232_s20, 0 }
   0xd   : > { %p1251_p8 = por %p254_p5, %p253_p3  ;;  %p303_p9 = scmp.lt.s32.totalorder %s1139_s14, 3 }
   0xe   : > { %s1257_s22 = scalar_select %p235_p7, %s1127_s11, %s237_s18  }
   0xf   : > { %p304_p10 = pnand %p877_p6, %p303_p9 }
  0x10   : > { %s1394_s23 = sand.u32 (!%p304_p10), 1, %s1123_s10   ;;  %p338_p11 = scmp.lt.s32.totalorder (!%p304_p10), %s1131_s12, 1 }
  0x11   : > { %307 = sbr.rel (%p304_p10) target bundleno = 1356 (0x54c), region = 56  ;;  %s878_s24 = sshll.u32 (!%p304_p10), %s1394_s23, 3 }
  0x12   : > { %s1398_s0 = sld [smem:[#allocation7_spill]] (!%p304_p10)  ;;  %s1269_s15 = scalar_lea.vmem (!%p304_p10), [#allocation4], %s878_s24 }
  0x13   : > { %s1271_s16 = smov (!%p304_p10), 0  }
  0x16   : > { %s339_s25 = scalar_select %p338_p11, %s1131_s12, 1 }
  0x18   : > { %s879_s26 = sshll.u32 %s339_s25, 2 }
  0x19   : > { %s1267_s29 = scalar_lea.vmem %s1398_s0, %s879_s26 }
  0x1a LB: >> { %v1149_v0 = vmov 0.0   ;;  %s910_s18 = sshll.u32 %s1143_s16, 4  ;;  %vm1150_vm0 = vmmov 0   ;;  %v353_v5 = vld [vmem:[%s1267_s29] sm:$0xf]  ;;  %vm381_vm1 = vcmask 261120   ;;  %s361_s25 = scalar_lea.vmem %s1388_s4, %s1143_s16  ;;  %s1143_s16 = sphi %s1271_s16, %s352_s16  }
  0x1b   : >> { %928 = vmatprep.subr.bf16.mxu0 %v1149_v0  ;;  %936 = vmatprep.subr.bf16.mxu1 %v1149_v0  ;;  %s356_s24 = scalar_lea.vmem %s1387_s3, %s910_s18  ;;  %s426_s28 = scalar_lea.vmem %s1389_s5, %s910_s18  ;;  %v882_v6 = vld [vmem:[%s361_s25] ss:$0 sm:$0xff]  ;;  %vm494_vm2 = vcmask 27648  }
  0x1c   : >> { %932 = vmatprep.mubr.msk.bf16.mxu0 %vm1150_vm0, %v1149_v0  ;;  %940 = vmatprep.mubr.msk.bf16.mxu1 %vm1150_vm0, %v1149_v0  ;;  %v1045_v1 = vld [vmem:[%s356_s24 + $0x8] sm:$0xff]   ;;  %v1047_v3 = vld [vmem:[%s356_s24] sm:$0xff]   ;;  %s431_s24 = scalar_lea.vmem %s1390_s6, %s1143_s16  ;;  %s891_s23 = sshll.u32 %s1143_s16, 2 }
  0x1d   : >> { %v1046_v2 = vld [vmem:[%s426_s28 + $0x8] sm:$0xff]   ;;  %929 = vmatpush3.bf16.msra.mxu0 %v1045_v1  ;;  %v1048_v4 = vld [vmem:[%s426_s28] sm:$0xff]   ;;  %s493_s28 = scalar_lea.vmem [#allocation2], %s891_s23  ;;  %s498_s20 = scalar_lea.vmem [#allocation3], %s891_s23 }
  0x1e   : >> { %937 = vmatpush3.bf16.msra.mxu1 %v1046_v2  ;;  %930 = vmatprep.subr.bf16.mxu0 %v1149_v0  ;;  %v887_v7 = vld [vmem:[%s431_s24] ss:$0 sm:$0xff]  ;;  %s352_s16 = sadd.s32 1, %s1143_s16  }
  0x1f   : >> { %938 = vmatprep.subr.bf16.mxu1 %v1149_v0  ;;  %p349_p12 = scmp.ge.s32.totalorder %s352_s16, 8  }
  0x20   : > { %v893_v20 = vld [vmem:[%s1392_s8] ss:$0 sm:$0xff] (%p349_p12)  ;;  %s1303_s26 = smov (%p349_p12), 0  }
  0x21   : >> { %931 = vmatpush3.bf16.msra.mxu0 %v1047_v3  ;;  %508 = vst.msk [vmem:[%s1269_s15] sm:$0xff] (%p349_p12), %vm381_vm1, %v893_v20 }
  0x22   : >> { %939 = vmatpush3.bf16.msra.mxu1 %v1048_v4 }
  0x24   : >> { %933 = vmatmul.mubr.msk.bf16.vlgmr.msra.gmra.mxu0 %vm381_vm1, %v353_v5 }
  0x25   : >> { %941 = vmatmul.mubr.msk.bf16.vlgmr.msra.gmra.mxu1 %vm381_vm1, %v353_v5 }
  0xe4   : >> { %v419_v8 = vpop.f32.mrf.mxu0 }
  0xe5   : >> { %v420_v9 = vadd.f32 %v882_v6, %v419_v8  ;;  %v485_v10 = vpop.f32.mrf.mxu1 }
  0xe6   : >> { %v486_v11 = vadd.f32 %v887_v7, %v485_v10  ;;  %v934_v12 = vpop.f32.mrf.mxu0 }
  0xe7   : >> { %v491_v13 = vpack.c.bf16 %v420_v9, %v420_v9  ;;  %v942_v14 = vpop.f32.mrf.mxu1  ;;  %351 = sbr.rel (!%p349_p12) target bundleno = 26 (0x1a), region = 121 }
  0xe8   : >> { %v496_v15 = vpack.c.bf16 %v486_v11, %v486_v11  ;;  %v422_v16 = vpop.f32.mrf.mxu0 }
  0xe9   : >> { %495 = vst.msk [vmem:[%s493_s28] sm:$0xf] %vm494_vm2, %v491_v13  ;;  %v488_v17 = vpop.f32.mrf.mxu1 }
  0xea   : >> { %499 = vst.msk [vmem:[%s498_s20] sm:$0xf] %vm494_vm2, %v496_v15  ;;  %v935_v18 = vpop.f32.mrf.mxu0 }
  0xeb   : >> { %v943_v19 = vpop.f32.mrf.mxu1 }
  0xec LB: >> { %v1151_v21 = vmov 0.0   ;;  %vm1152_vm3 = vmmov 0   ;;  %s912_s23 = sshll.u32 %s1147_s26, 4  ;;  %s900_s16 = sshll.u32 %s1147_s26, 2  ;;  %vm598_vm4 = vcmask 31744   ;;  %vm645_vm5 = vcmask 64512   ;;  %s1147_s26 = sphi %s1303_s26, %s515_s26  }
  0xed   : >> { %944 = vmatprep.subr.bf16.mxu0 %v1151_v21  ;;  %948 = vmatprep.mubr.msk.bf16.mxu0 %vm1152_vm3, %v1151_v21  ;;  %s523_s28 = scalar_lea.vmem %s1385_s1, %s912_s23  ;;  %s592_s20 = scalar_lea.vmem [#allocation2], %s900_s16  ;;  %v520_v26 = vld [vmem:[%s1267_s29] sm:$0xf]  ;;  %vm661_vm6 = vcmask 1043456   ;;  %vm713_vm7 = vcmask 1041408  }
  0xee   : >> { %952 = vmatprep.subr.bf16.mxu1 %v1151_v21  ;;  %954 = vmatprep.mubr.msk.bf16.mxu1 %vm1152_vm3, %v1151_v21  ;;  %v1049_v22 = vld [vmem:[%s523_s28 + $0x8] sm:$0xff]   ;;  %v1050_v23 = vld [vmem:[%s523_s28] sm:$0xff]   ;;  %s528_s23 = scalar_lea.vmem %s1386_s2, %s1147_s26  ;;  %s595_s27 = scalar_lea.vmem [#allocation3], %s900_s16 }
  0xef   : >> { %945 = vmatpush3.bf16.msra.mxu0 %v1049_v22  ;;  %v896_v27 = vld [vmem:[%s528_s23] ss:$0 sm:$0xff]  ;;  %s904_s24 = sshll.u32 %s1147_s26, 1  ;;  %s515_s26 = sadd.s32 1, %s1147_s26  }
  0xf0   : >> { %v593_v24 = vld [vmem:[%s592_s20] sm:$0xf]  ;;  %946 = vmatprep.subr.bf16.mxu0 %v1151_v21  ;;  %s708_s18 = scalar_lea.vmem %s1391_s7, %s904_s24  ;;  %p512_p13 = scmp.ge.s32.totalorder %s515_s26, 8  }
  0xf1   : >> { %v603_v25 = vsel %vm598_vm4, %v593_v24, 0  ;;  %v596_v44 = vld [vmem:[%s595_s27] sm:$0xf]  ;;  %s907_s16 = sshll.u32 (%p512_p13), %s1131_s12, 7  ;;  %s774_s24 = sshll.u32 (%p512_p13), %s1269_s15, 4  ;;  %s775_s24 = int_to_ptr.vmem [resolvable:$true] %s774_s24 }
  0xf2   : >> { %953 = vmatpush3.bf16.xpose.msra.mxu1 %v603_v25  ;;  %v663_v45 = vsel %vm661_vm6, %v596_v44, 0  ;;  %v709_v46 = vld [vmem:[%s708_s18] sm:$0x3]  ;;  %s772_s27 = scalar_lea.hbm (%p512_p13), %s1393_s9, %s907_s16  ;;  %s1399_s28 = sand.u32 (%p512_p13), 1, %s1123_s10  }
  0xf3   : >> { %964 = vmatprep.subr.bf16.mxu1 %v1151_v21  ;;  %947 = vmatpush3.bf16.msra.mxu0 %v1050_v23  ;;  %v715_v47 = vsel %vm713_vm7, %v709_v46, 0  ;;  %v705_v57 = vld [vmem:[%s1269_s15] sm:$0xff]  ;;  %s760_s20 = scalar_lea.sflag (%p512_p13), [#allocation5], %s1399_s28  ;;  %s1055_s18 = scalar_lea.vmem (%p512_p13), %s775_s24, 128 }
  0xf4   : >> { %958 = vmatprep.subr.bf16.mxu0 %v1151_v21  ;;  %p1056_p0 = scmp.ne.s32.totalorder (%p512_p13), %s775_s24, %s1055_s18  ;;  %s1153_s26 = smov (%p512_p13), [#allocation4]  }
  0xf5   : > { %s1059_s0 = sshll.u32 (%p512_p13), %s1153_s26, 4  ;;  %s1060_s0 = int_to_ptr.vmem [resolvable:$false] %s1059_s0 }
  0xf6   : >> { %949 = vmatmul.mubr.msk.bf16.vlgmr.msra.gmra.mxu0 %vm381_vm1, %v520_v26  ;;  %p1057_p1 = pnand (%p512_p13), %p1056_p0, %p1244_p4  ;;  %s1061_s29 = scalar_lea.vmem (%p512_p13), %s1060_s0, 256 }
  0xf7   : >> { %960 = vmatprep.mubr.msk.bf16.mxu0 %vm1152_vm3, %v1151_v21  ;;  %959 = vmatpush3.bf16.msra.mxu0 %v663_v45  ;;  %p1062_p3 = scmp.lt.s32.totalorder (%p512_p13), %s775_s24, %s1060_s0  ;;  %p1063_p5 = scmp.lt.s32.totalorder (%p512_p13), %s1061_s29, %s1055_s18 }
  0xf8   : > { %p1058_p2 = pneg (%p512_p13), %p1057_p1 }
  0xf9   : > { %p1064_p6 = por (%p512_p13), %p1063_p5, %p1062_p3 }
  0xfb   : > { %p1065_p7 = pnand (%p512_p13), %p1064_p6, %p1058_p2 }
 0x1b6   : >> { %v585_v28 = vpop.f32.mrf.mxu0 }
 0x1b7   : >> { %v586_v29 = vadd.f32 %v896_v27, %v585_v28 }
 0x1b8   : >> { %v950_v30 = vpop.f32.mrf.mxu0 }
 0x1b9   : >> { %v597_v31 = vpack.c.bf16 %v586_v29, %v586_v29 }
 0x1ba   : >> { %v588_v32 = vpop.f32.mrf.mxu0 }
 0x1bb   : >> { %955 = vmatmul.mubr.msk.bf16.vlgmr.msra.gmra.mxu1 %vm598_vm4, %v597_v31 }
 0x1bc   : >> { %v951_v33 = vpop.f32.mrf.mxu0  ;;  %966 = vmatprep.mubr.msk.bf16.mxu1 %vm1152_vm3, %v1151_v21  ;;  %965 = vmatpush3.bf16.msra.mxu1 %v715_v47 }
 0x27b   : >> { %v639_v34 = vpop.f32.mrf.mxu1 }
 0x27c   : >> { %v646_v35 = vsel %vm645_vm5, %v639_v34, -inf }
 0x27d   : >> { %647 = vmax.xlane.f32.xlu0 %v646_v35  ;;  %v956_v36 = vpop.f32.mrf.mxu1 }
 0x27f   : >> { %v642_v37 = vpop.f32.mrf.mxu1 }
 0x281   : >> { %v957_v38 = vpop.f32.mrf.mxu1 }
 0x306   : >> { %v648_v39 = vpop.xlane.xlu0 %647 }
 0x307   : >> { %v649_v40 = vsub.f32 %v639_v34, %v648_v39 }
 0x309   : >> { %v650_v41 = vmul.f32 1.442695, %v649_v40 }
 0x30b   : >> { %1051 = vpow2.f32 %v650_v41 }
 0x318   : >> { %v1052_v42 = vpop.eup %1051 }
 0x319   : >> { %v652_v43 = vsel %vm645_vm5, %v1052_v42, 0.0 }
 0x31a   : >> { %653 = vadd.xlane.f32.xlu0 %v652_v43 }
 0x3a3   : >> { %v654_v48 = vpop.xlane.xlu0 %653 }
 0x3a4   : >> { %1053 = vrcp.f32 %v654_v48 }
 0x3b1   : >> { %v1054_v49 = vpop.eup %1053 }
 0x3b2   : >> { %v656_v50 = vmul.f32 %v1054_v49, %v1052_v42 }
 0x3b4   : >> { %v657_v51 = vpack.c.bf16 %v656_v50, %v656_v50 }
 0x3b6   : >> { %961 = vmatmul.mubr.msk.bf16.vlgmr.msra.gmra.mxu0 %vm645_vm5, %v657_v51 }
 0x476   : >> { %v699_v52 = vpop.f32.mrf.mxu0 }
 0x477   : >> { %v706_v53 = vpack.c.bf16 %v699_v52, %v699_v52 }
 0x478   : >> { %v962_v54 = vpop.f32.mrf.mxu0 }
 0x479   : >> { %967 = vmatmul.mubr.msk.bf16.vlgmr.msra.gmra.mxu1 %vm598_vm4, %v706_v53 }
 0x47a   : >> { %v702_v55 = vpop.f32.mrf.mxu0 }
 0x47c   : >> { %v963_v56 = vpop.f32.mrf.mxu0 }
 0x539   : >> { %v751_v58 = vpop.f32.mrf.mxu1 }
 0x53a   : >> { %v757_v59 = vadd.f32 %v751_v58, %v705_v57 }
 0x53b   : >> { %v968_v60 = vpop.f32.mrf.mxu1  ;;  %514 = sbr.rel (!%p512_p13) target bundleno = 236 (0xec), region = 132 }
 0x53c   : >> { %758 = vst.msk [vmem:[%s1269_s15] sm:$0xff] %vm381_vm1, %v757_v59 }
 0x53d   : >> { %v754_v61 = vpop.f32.mrf.mxu1 }
 0x53f   : >> { %v969_v62 = vpop.f32.mrf.mxu1 }
 0x540   : > { %1068 = shalt.err (!%p1065_p7)
}
 0x541   : > { %s1069_s12 = scalar_lea.hbm %s772_s27, 128  ;;  %s1073_s25 = scalar_lea.hbm %s1393_s9, 256 }
 0x542   : > { %p1070_p9 = scmp.ne.s32.totalorder %s772_s27, %s1069_s12  ;;  %p1074_p12 = scmp.lt.s32.totalorder %s772_s27, %s1393_s9 }
 0x543   : > { %p1075_p13 = scmp.lt.s32.totalorder %s1073_s25, %s1069_s12 }
 0x544   : > { %p1071_p10 = pnand %p1070_p9, %p1244_p4 }
 0x545   : > { %p1076_p0 = por %p1075_p13, %p1074_p12 }
 0x546   : > { %p1072_p11 = pneg %p1071_p10 }
 0x548   : > { %p1077_p1 = pnand %p1076_p0, %p1072_p11 }
 0x54a   : > { %1080 = shalt.err (!%p1077_p1)
}
 0x54b   : > { %970 = dma.vmem_to_hbm [thread:$0]  (%p1244_p4), %s775_s24, 128, %s772_s27, %s760_s20  }
 0x54c PF: > { %p976_p2 = scmp.ge.s32.totalorder %s1139_s14, 2  ;;  %s786_s0 = sand.u32 1, %s1119_s30  }
 0x54d   : > { %s787_s18 = scalar_lea.sflag [#allocation5], %s786_s0 }
 0x54e   : > { %p973_p3 = pnand %p976_p2, %p1251_p8 }
 0x550   : > { %p974_p5 = pneg %p973_p3 }
 0x552   : > { %1114 = dma.done.wait (%p974_p5), %s787_s18, 128  }
 0x553   : > { %1116 = vsyncadd (%p974_p5), %s787_s18, 4294967168  ;;  %s22_s14 = sadd.s32 1, %s1139_s14   ;;  %s1400_s30 = smov %s1123_s10 }
 0x554   : > { %p19_p6 = scmp.ge.s32.totalorder %s22_s14, 4   ;;  %s1401_s10 = smov %s1127_s11 }
 0x555   : > { %s1402_s11 = smov %s1257_s22  ;;  %s1403_s12 = smov %s1135_s13 }
 0x556   : > { %s1404_s13 = smov %s1406_s17  ;;  %21 = sbr.rel (!%p19_p6) target bundleno = 6 (0x6), region = 143 }
 0x55b   :  { %792 = vsyncpa [#allocation5], 1 }
 0x55c   :  { %794 = vsyncpa [#allocation5 + $0x1], 1 }

</bundles_post_ra>
